<compile_context>
chip_gen: v6e
topology: v6e:2x2x1
jax: 0.10.0
libtpu: 0.0.40
codegen_flags: <defaults>
</compile_context>

<pallas_src>
import jax
import jax.numpy as jnp
from jax.experimental import pallas as pl
from jax.experimental.pallas import tpu as pltpu


_TARGET_BLOCK_BYTES = 2 << 20        # ~2 MiB per coord stream per step
_VMEM_LIMIT_BYTES = 32 * 1024 * 1024  # safe on v5e/v6e/v7x for this footprint


# ----------------------------- helpers ---------------------------------------
def _round_up(x, m):
    return ((x + m - 1) // m) * m


def _cdiv(a, b):
    return -(-a // b)


def _sublane_rows(dtype):
    # native sublane tile height: 8 for 32-bit, 16 for 16-bit, 32 for 8-bit/bool
    size = jnp.dtype(dtype).itemsize
    if size >= 4:
        return 8
    if size == 2:
        return 16
    return 32


def _apply_valid(diff, valid):
    # Applied in-register; wrapper never materializes valid.astype(...).
    if valid.dtype == jnp.bool_:
        return jnp.where(valid, diff, jnp.zeros_like(diff))
    return diff * valid.astype(diff.dtype)


# ----------------------------- kernels ----------------------------------------
def _coord_loss_flat_kernel(out_ref, gt_ref, valid_ref, loss_ref):
    diff = jnp.abs(out_ref[...] - gt_ref[...])
    loss_ref[...] = _apply_valid(diff, valid_ref[...])


def _coord_loss_3d_kernel(out_ref, gt_ref, valid_ref, is3d_ref, zmask_ref, loss_ref):
    diff = jnp.abs(out_ref[...] - gt_ref[...])
    base = _apply_valid(diff, valid_ref[...])
    one = jnp.ones((), dtype=base.dtype)
    # zmask_ref: (1, L) bool (same block every step); is3d_ref: (tb, 1)
    scale = jnp.where(zmask_ref[...], is3d_ref[...].astype(base.dtype), one)
    loss_ref[...] = base * scale


# ----------------------------- reference --------------------------------------
def _coord_loss_ref(coord_out, coord_gt, valid, is_3D=None):
    loss = jnp.abs(coord_out - coord_gt) * valid.astype(coord_out.dtype)
    if is_3D is not None:
        B = coord_out.shape[0]
        bshape = (B,) + (1,) * (coord_out.ndim - 1)
        is3d = jnp.ravel(is_3D).astype(loss.dtype)
        if is3d.shape[0] == 1 and B > 1:
            is3d = jnp.broadcast_to(is3d, (B,))
        is3d = is3d.reshape(bshape)
        loss = jnp.concatenate([loss[..., :2], loss[..., 2:] * is3d], axis=-1)
    return loss


# ----------------------------- wrapper ----------------------------------------
def coord_loss(coord_out, coord_gt, valid, is_3D=None, *,
               block_elems=None, block_rows=None, force_pallas=False):
    """Pallas implementation of CoordLoss.forward (returns the elementwise loss)."""
    assert coord_out.shape == coord_gt.shape == valid.shape
    dtype = coord_out.dtype

    # Tiny tensors: kernel launch + per-step overhead dominates, XLA's fused
    # elementwise op is at least as fast. Skip Pallas unless forced.
    if not force_pallas and coord_out.size < 8 * 128:
        return _coord_loss_ref(coord_out, coord_gt, valid, is_3D)

    compiler_params = pltpu.CompilerParams(
        dimension_semantics=("parallel",),
        vmem_limit_bytes=_VMEM_LIMIT_BYTES,
    )

    if is_3D is None:
        # -------- fully elementwise: flatten and tile lane-dense --------------
        N = coord_out.size
        out1 = coord_out.reshape(N)
        gt1 = coord_gt.reshape(N)
        valid1 = valid.reshape(N)  # no dtype cast in the wrapper

        granule = max(_sublane_rows(dtype), _sublane_rows(valid.dtype)) * 128
        itemsize = jnp.dtype(dtype).itemsize
        if block_elems is None:
            blk = max(granule,
                      ((_TARGET_BLOCK_BYTES // itemsize) // granule) * granule)
        else:
            blk = block_elems
        if N > granule:
            # guarantee >=2 grid steps so megacore (v7x) can split the axis
            blk = min(blk, _round_up(_cdiv(N, 2), granule))
        if blk >= N:
            blk = N
        grid = (_cdiv(N, blk),)

        spec = pl.BlockSpec((blk,), lambda i: (i,))
        loss1 = pl.pallas_call(
            _coord_loss_flat_kernel,
            out_shape=jax.ShapeDtypeStruct((N,), dtype),
            grid=grid,
            in_specs=[spec, spec, spec],
            out_specs=spec,
            compiler_params=compiler_params,
        )(out1, gt1, valid1)
        return loss1.reshape(coord_out.shape)

    # ---------- is_3D path: keep batch rows, lanes carry J*D elements ---------
    orig_shape = coord_out.shape
    B = orig_shape[0]
    D = orig_shape[-1]
    L = coord_out.size // B

    out2 = coord_out.reshape(B, L)
    gt2 = coord_gt.reshape(B, L)
    valid2 = valid.reshape(B, L)  # no dtype cast in the wrapper

    is3d_flat = jnp.ravel(is_3D).astype(dtype)
    if is3d_flat.shape[0] == 1 and B > 1:
        is3d_flat = jnp.broadcast_to(is3d_flat, (B,))
    is3d2 = is3d_flat.reshape(B, 1)  # tiny (B, 1)

    # z-lane mask hoisted out of the per-step body: one (1, L) bool block,
    # index_map always returns (0, 0) so it is loaded once and reused.
    zmask = (jnp.arange(L, dtype=jnp.int32) % D >= 2).reshape(1, L)

    granule_rows = max(_sublane_rows(dtype), _sublane_rows(valid.dtype))
    row_bytes = max(1, L * jnp.dtype(dtype).itemsize)
    if block_rows is None:
        tb = max(granule_rows,
                 ((_TARGET_BLOCK_BYTES // row_bytes) // granule_rows) * granule_rows)
    else:
        tb = block_rows
    if B > granule_rows:
        # >=2 grid steps when the batch allows it (megacore on v7x)
        tb = min(tb, _round_up(_cdiv(B, 2), granule_rows))
    if tb >= B:
        tb = B  # never exceed the batch (no single oversized padded block)
    grid = (_cdiv(B, tb),)

    data_spec = pl.BlockSpec((tb, L), lambda i: (i, 0))
    is3d_spec = pl.BlockSpec((tb, 1), lambda i: (i, 0))
    zmask_spec = pl.BlockSpec((1, L), lambda i: (0, 0))

    loss2 = pl.pallas_call(
        _coord_loss_3d_kernel,
        out_shape=jax.ShapeDtypeStruct((B, L), dtype),
        grid=grid,
        in_specs=[data_spec, data_spec, data_spec, is3d_spec, zmask_spec],
        out_specs=data_spec,
        compiler_params=compiler_params,
    )(out2, gt2, valid2, is3d2, zmask)
    return loss2.reshape(orig_shape)


# ----------------------------- test -------------------------------------------
if __name__ == "__main__":
    key = jax.random.PRNGKey(0)

    def make_inputs(k, B, J, D=3, valid_bool=True, dtype=jnp.float32):
        k1, k2, k3, k4 = jax.random.split(k, 4)
        co = jax.random.normal(k1, (B, J, D), dtype=dtype)
        cg = jax.random.normal(k2, (B, J, D), dtype=dtype)
        vb = jax.random.bernoulli(k3, 0.8, (B, J, D))
        va = vb if valid_bool else vb.astype(dtype)
        i3 = jax.random.bernoulli(k4, 0.5, (B, 1)).astype(dtype)
        return co, cg, va, i3

    ks = jax.random.split(key, 3)

    # 1) small, single block, is_3D path (forced Pallas), bool valid mask
    co, cg, va, i3 = make_inputs(ks[0], B=2, J=8, valid_bool=True)
    got = coord_loss(co, cg, va, i3, force_pallas=True)
    jax.block_until_ready(got)
    assert jnp.allclose(got, _coord_loss_ref(co, cg, va, i3), atol=1e-6), \
        "mismatch (small is_3D path)"

    # 2) small, no is_3D -> flat lane-dense path, bool valid mask
    got = coord_loss(co, cg, va, force_pallas=True)
    jax.block_until_ready(got)
    assert jnp.allclose(got, _coord_loss_ref(co, cg, va), atol=1e-6), \
        "mismatch (small flat path)"

    # 3) multi-block is_3D path (2 grid steps), float valid weights
    co, cg, va, i3 = make_inputs(ks[1], B=64, J=24, valid_bool=False)
    got = coord_loss(co, cg, va, i3, force_pallas=True)
    jax.block_until_ready(got)
    assert jnp.allclose(got, _coord_loss_ref(co, cg, va, i3), atol=1e-6), \
        "mismatch (tiled is_3D path)"

    # 4) multi-block flat path with a ragged last block, bool valid mask
    co, cg, va, _ = make_inputs(ks[2], B=64, J=24, valid_bool=True)
    got = coord_loss(co, cg, va, force_pallas=True)
    jax.block_until_ready(got)
    assert jnp.allclose(got, _coord_loss_ref(co, cg, va), atol=1e-6), \
        "mismatch (tiled flat path)"

    print("KERNEL_OK")
</pallas_src>

<mosaic_0001>
module attributes {stable_mosaic.version = 11 : i64} {
  func.func @_coord_loss_3d_kernel(%arg0: i32, %arg1: memref<2x24xf32, #tpu.memory_space<vmem>>, %arg2: memref<2x24xf32, #tpu.memory_space<vmem>>, %arg3: memref<2x24xi32, #tpu.memory_space<vmem>>, %arg4: memref<2x1xf32, #tpu.memory_space<vmem>>, %arg5: memref<1x24xi32, #tpu.memory_space<vmem>>, %arg6: memref<2x24xf32, #tpu.memory_space<vmem>>) attributes {dimension_semantics = [#tpu.dimension_semantics<parallel>], iteration_bounds = array<i64: 1>, scalar_prefetch = 0 : i64, scratch_operands = 0 : i64, tpu.core_type = #tpu.core_type<tc>, window_params = [{transform_indices = @transform_0, window_bounds = array<i64: 2, 24>}, {transform_indices = @transform_1, window_bounds = array<i64: 2, 24>}, {transform_indices = @transform_2, window_bounds = array<i64: 2, 24>}, {transform_indices = @transform_3, window_bounds = array<i64: 2, 1>}, {pipeline_mode = #tpu.pipeline_mode<synchronous>, transform_indices = @transform_4, window_bounds = array<i64: 1, 24>}, {transform_indices = @transform_5, window_bounds = array<i64: 2, 24>}]} {
    %c0 = arith.constant 0 : index
    %c0_0 = arith.constant 0 : index
    %0 = vector.load %arg1[%c0, %c0_0] : memref<2x24xf32, #tpu.memory_space<vmem>>, vector<2x24xf32>
    %c0_1 = arith.constant 0 : index
    %c0_2 = arith.constant 0 : index
    %1 = vector.load %arg2[%c0_1, %c0_2] : memref<2x24xf32, #tpu.memory_space<vmem>>, vector<2x24xf32>
    %2 = arith.subf %0, %1 : vector<2x24xf32>
    %3 = math.absf %2 : vector<2x24xf32>
    %c0_3 = arith.constant 0 : index
    %c0_4 = arith.constant 0 : index
    %4 = vector.load %arg3[%c0_3, %c0_4] : memref<2x24xi32, #tpu.memory_space<vmem>>, vector<2x24xi32>
    %cst = arith.constant dense<0> : vector<2x24xi32>
    %5 = arith.cmpi ne, %4, %cst : vector<2x24xi32>
    %cst_5 = arith.constant 0.000000e+00 : f32
    %6 = vector.broadcast %cst_5 : f32 to vector<2x24xf32>
    %7 = arith.select %5, %3, %6 : vector<2x24xi1>, vector<2x24xf32>
    %c0_6 = arith.constant 0 : index
    %c0_7 = arith.constant 0 : index
    %8 = vector.load %arg5[%c0_6, %c0_7] : memref<1x24xi32, #tpu.memory_space<vmem>>, vector<1x24xi32>
    %cst_8 = arith.constant dense<0> : vector<1x24xi32>
    %9 = arith.cmpi ne, %8, %cst_8 : vector<1x24xi32>
    %c0_9 = arith.constant 0 : index
    %c0_10 = arith.constant 0 : index
    %10 = vector.load %arg4[%c0_9, %c0_10] : memref<2x1xf32, #tpu.memory_space<vmem>>, vector<2x1xf32>
    %cst_11 = arith.constant 1.000000e+00 : f32
    %11 = vector.shape_cast %9 : vector<1x24xi1> to vector<1x24xi1>
    %12 = vector.broadcast %11 : vector<1x24xi1> to vector<2x24xi1>
    %13 = vector.shape_cast %10 : vector<2x1xf32> to vector<2x1xf32>
    %14 = vector.broadcast %13 : vector<2x1xf32> to vector<2x24xf32>
    %15 = vector.broadcast %cst_11 : f32 to vector<2x24xf32>
    %16 = arith.select %12, %14, %15 : vector<2x24xi1>, vector<2x24xf32>
    %17 = arith.mulf %7, %16 : vector<2x24xf32>
    %c0_12 = arith.constant 0 : index
    %c0_13 = arith.constant 0 : index
    %18 = vector.load %arg6[%c0_12, %c0_13] : memref<2x24xf32, #tpu.memory_space<vmem>>, vector<2x24xf32>
    tpu.vector_store %arg6[%c0_12, %c0_13], %17 {strides = array<i32>} : memref<2x24xf32, #tpu.memory_space<vmem>>, vector<2x24xf32>,
    return
  }
  func.func @transform_0(%arg0: i32) -> (i32, i32) {
    %c0_i32 = arith.constant 0 : i32
    %c0_i32_0 = arith.constant 0 : i32
    return %arg0, %c0_i32 : i32, i32
  }
  func.func @transform_1(%arg0: i32) -> (i32, i32) {
    %c0_i32 = arith.constant 0 : i32
    %c0_i32_0 = arith.constant 0 : i32
    return %arg0, %c0_i32 : i32, i32
  }
  func.func @transform_2(%arg0: i32) -> (i32, i32) {
    %c0_i32 = arith.constant 0 : i32
    %c0_i32_0 = arith.constant 0 : i32
    return %arg0, %c0_i32 : i32, i32
  }
  func.func @transform_3(%arg0: i32) -> (i32, i32) {
    %c0_i32 = arith.constant 0 : i32
    %c0_i32_0 = arith.constant 0 : i32
    return %arg0, %c0_i32 : i32, i32
  }
  func.func @transform_4(%arg0: i32) -> (i32, i32) {
    %c0_i32 = arith.constant 0 : i32
    %c0_i32_0 = arith.constant 0 : i32
    %c0_i32_1 = arith.constant 0 : i32
    return %c0_i32, %c0_i32_0 : i32, i32
  }
  func.func @transform_5(%arg0: i32) -> (i32, i32) {
    %c0_i32 = arith.constant 0 : i32
    %c0_i32_0 = arith.constant 0 : i32
    return %arg0, %c0_i32 : i32, i32
  }
}

</mosaic_0001>

<bundles_post_ra>
// kernel: tpu_custom_call.1
= control target key start
LH: loop header
LB: loop body
LE: loop exit
PB: predicated region body
PF: predicated region fallthrough
CT: control target
= control target key end

     0   :  { %v85_v1 = vmov 0   ;;  %s135_s0 = inlined_call_operand.vmem [shape: f32[2,24], index: 0, kind: input, shape index: {}]   ;;  %s136_s1 = inlined_call_operand.vmem [shape: f32[2,24], index: 1, kind: input, shape index: {}]   ;;  %s137_s2 = inlined_call_operand.vmem [shape: s32[2,24], index: 2, kind: input, shape index: {}]   ;;  %s138_s3 = inlined_call_operand.vmem [shape: f32[2,1], index: 3, kind: input, shape index: {}]   ;;  %s139_s4 = inlined_call_operand.vmem [shape: s32[1,24], index: 4, kind: input, shape index: {}]   ;;  %s140_s5 = inlined_call_operand.hbm [shape: f32[2,24], index: 5, kind: output, shape index: {}]  }
   0x1   :  { %v30_v0 = vld [vmem:[%s138_s3] sm:$0x3]  ;;  %62 = vset.pattern.permute.xlu0 %v85_v1 }
   0x2   :  { %39 = vperm.xlu0 %62, %v30_v0  }
   0x3   :  { %10 = vsyncpa [#allocation3], 0  ;;  %v32_v2 = vlaneseq  ;;  %v28_v3 = vld [vmem:[%s139_s4] sm:$0x1]  ;;  %s86_s4 = smov [#allocation2]   ;;  %vm44_vm3 = vcmask 189440  }
   0x4   :  { %vm29_vm0 = vcmp.ne.s32.totalorder %v28_v3, 0  ;;  %v21_v5 = vld [vmem:[%s135_s0] sm:$0x3]  ;;  %s52_s27 = sshll.u32 %s86_s4, 4  ;;  %s53_s27 = int_to_ptr.vmem [resolvable:$true] %s52_s27 }
   0x5   :  { %v33_v4 = vshrl.u32 %v32_v2, 7  ;;  %v22_v6 = vld [vmem:[%s136_s1] sm:$0x3]  ;;  %v31_v8 = vsel %vm29_vm0, 1, %v85_v1  ;;  %s63_s0 = scalar_lea.vmem %s53_s27, 32  ;;  %p68_p1 = scmp.lt.s32.totalorder %s53_s27, %s53_s27 }
   0x6   :  { %v23_v9 = vsub.f32 %v21_v5, %v22_v6  ;;  %v25_v10 = vld [vmem:[%s137_s2] sm:$0x3]  ;;  %p64_p0 = scmp.ne.s32.totalorder %s53_s27, %s63_s0  ;;  %p69_p2 = scmp.lt.s32.totalorder %s63_s0, %s63_s0 }
   0x7   :  { %v34_v7 = vsub.s32 0, %v33_v4  ;;  %vm26_vm1 = vcmp.ne.s32.totalorder %v25_v10, 0 }
   0x8   :  { %v24_v12 = vand.u32 2147483647, %v23_v9  ;;  %p70_p3 = por %p69_p2, %p68_p1 }
   0x9   :  { %v35_v11 = vrot.slane %v31_v8, %v34_v7 }
   0xa   :  { %v27_v13 = vsel %vm26_vm1, %v24_v12, 0.0  ;;  %p71_p4 = pnand %p70_p3, %p64_p0 }
   0xb   :  { %vm36_vm2 = vcmp.eq.s32.totalorder %v35_v11, 1 }
  0x7d   :  { %v40_v14 = vpop.permute.xlu0 %39 }
  0x7e   :  { %v42_v15 = vsel %vm36_vm2, %v40_v14, 1.0 }
  0x7f   :  { %v43_v16 = vmul.f32 %v42_v15, %v27_v13 }
  0x81   :  { %45 = vst.msk [vmem:[#allocation2] sm:$0x3] %vm44_vm3, %v43_v16 }
  0x82   :  { %74 = shalt.err (!%p71_p4)
}
  0x83   :  { %55 = dma.vmem_to_hbm [thread:$0]  %s53_s27, 32, %s140_s5, [#allocation3]  }
  0x84   :  { %83 = dma.done.wait [#allocation3], 32  }
  0x85   :  { %84 = vsyncadd [#allocation3], 4294967264 }
  0x86   :  { %59 = vsyncpa [#allocation3], 1 }

</bundles_post_ra>
